<compile_context>
chip_gen: v7x
topology: tpu7x:2x2x1
jax: 0.10.0
libtpu: 0.0.40
codegen_flags: <defaults>
</compile_context>

<pallas_src>
import math

import jax
import jax.numpy as jnp
from jax.experimental import pallas as pl
from jax.experimental.pallas import tpu as pltpu


def _bilinear_kernel(u_ref, v_ref, wc_ref, wu_ref, wv_ref, w0_ref, out_ref):
    # u_ref, v_ref: (TB, D)     raw inputs (no bias column appended)
    # wc_ref:       (D*D, TO)   wc[i*D + j, o] = W[o, i, j]        (core)
    # wv_ref:       (D, TO)     wv[i, o]       = W[o, i, D]        (v-bias col, zeros if off)
    # wu_ref:       (D, TO)     wu[j, o]       = W[o, D, j]        (u-bias row, zeros if off)
    # w0_ref:       (1, TO)     w0[o]          = W[o, D, D]        (zeros unless both biases)
    # out_ref:      (TB, TO)
    tb, d = u_ref.shape
    u = u_ref[...]
    v = v_ref[...]

    # Kronecker feature block: x[b, i*D + j] = u[b, i] * v[b, j]   (VPU)
    x = (u[:, :, None] * v[:, None, :]).reshape(tb, d * d)

    # All contractions on the MXU, f32 accumulation only.
    acc = jnp.dot(x, wc_ref[...], preferred_element_type=jnp.float32)
    acc = acc + jnp.dot(u, wv_ref[...], preferred_element_type=jnp.float32)
    acc = acc + jnp.dot(v, wu_ref[...], preferred_element_type=jnp.float32)
    acc = acc + w0_ref[...].astype(jnp.float32)
    out_ref[...] = acc.astype(out_ref.dtype)


def prepare_bilinear_params(weight, *, bias_u=True, bias_v=True):
    """One-time (hoisted) weight re-layout.  weight: (O, D + bias_u, D + bias_v)."""
    o, du, dv = weight.shape
    d_u = du - (1 if bias_u else 0)
    d_v = dv - (1 if bias_v else 0)
    assert d_u == d_v, "in_features mismatch between u and v dims of the weight"
    d = d_u

    # Core: (O, D, D) -> (D, D, O) -> (D*D, O), row index = i*D + j.
    wc = jnp.transpose(weight[:, :d, :d], (1, 2, 0)).reshape(d * d, o)
    if bias_v:
        wv = jnp.transpose(weight[:, :d, d], (1, 0))      # (D, O)
    else:
        wv = jnp.zeros((d, o), weight.dtype)
    if bias_u:
        wu = jnp.transpose(weight[:, d, :d], (1, 0))       # (D, O)
    else:
        wu = jnp.zeros((d, o), weight.dtype)
    if bias_u and bias_v:
        w0 = weight[:, d, d].reshape(1, o)
    else:
        w0 = jnp.zeros((1, o), weight.dtype)
    return wc, wu, wv, w0


def bilinear_forward(u, v, params, *, block_b=128, block_o=256):
    assert u.shape == v.shape, "Inputs to Bilinear must have the same shape"
    assert u.ndim == 2, "Inputs to Bilinear must have a 2d shape"
    wc, wu, wv, w0 = params
    b, d = u.shape
    k, o = wc.shape
    assert k == d * d, "prepared weight does not match input feature size"

    # Tile sizes: full dims when small; otherwise 128/256-aligned tiles so the
    # output stores stay lane-dense and the pipeline is double-buffered.
    tb = b if b <= block_b else block_b
    to = o if o <= block_o else block_o
    grid = (pl.cdiv(b, tb), pl.cdiv(o, to))

    itemsize = jnp.dtype(u.dtype).itemsize
    tile_bytes = (2 * tb * d + (d * d + 2 * d + 1) * to + tb * to) * itemsize
    # Double-buffered inputs + headroom, clamped so it stays safe on v7x (64 MiB VMEM).
    vmem_limit = int(min(64 * 2**20, max(16 * 2**20, 4 * tile_bytes)))

    cost = pl.CostEstimate(
        flops=2 * b * o * (d * d + 2 * d + 1),
        transcendentals=0,
        bytes_accessed=int(
            (u.size + v.size + wc.size + wu.size + wv.size + w0.size + b * o)
            * itemsize
        ),
    )

    return pl.pallas_call(
        _bilinear_kernel,
        out_shape=jax.ShapeDtypeStruct((b, o), u.dtype),
        grid=grid,
        in_specs=[
            pl.BlockSpec((tb, d), lambda i, j: (i, 0)),          # u
            pl.BlockSpec((tb, d), lambda i, j: (i, 0)),          # v
            pl.BlockSpec((d * d, to), lambda i, j: (0, j)),      # core weight
            pl.BlockSpec((d, to), lambda i, j: (0, j)),          # u-bias weight
            pl.BlockSpec((d, to), lambda i, j: (0, j)),          # v-bias weight
            pl.BlockSpec((1, to), lambda i, j: (0, j)),          # constant term
        ],
        out_specs=pl.BlockSpec((tb, to), lambda i, j: (i, j)),
        compiler_params=pltpu.CompilerParams(
            dimension_semantics=("parallel", "parallel"),
            vmem_limit_bytes=vmem_limit,
        ),
        cost_estimate=cost,
    )(u, v, wc, wu, wv, w0)


def init_bilinear_weight(key, in_features, out_features, *, bias_u=True, bias_v=True):
    """Deterministic xavier_uniform_ init matching nn.init.xavier_uniform_."""
    du = in_features + (1 if bias_u else 0)
    dv = in_features + (1 if bias_v else 0)
    fan_in = du * dv            # size(1) * receptive_field
    fan_out = out_features * dv
    bound = math.sqrt(6.0 / (fan_in + fan_out))
    return jax.random.uniform(
        key, (out_features, du, dv), dtype=jnp.float32, minval=-bound, maxval=bound
    )


def _reference(u, v, weight, *, bias_u=True, bias_v=True):
    b = u.shape[0]
    ones = jnp.ones((b, 1), dtype=u.dtype)
    uu = jnp.concatenate([u, ones], -1) if bias_u else u
    vv = jnp.concatenate([v, ones], -1) if bias_v else v
    return jnp.einsum("bu,bv,ouv->bo", uu, vv, weight)


if __name__ == "__main__":
    batch = 8
    in_features = 32
    out_features = 16

    key = jax.random.PRNGKey(0)
    k_w, k_u, k_v = jax.random.split(key, 3)

    weight = init_bilinear_weight(k_w, in_features, out_features)
    u = jax.random.normal(k_u, (batch, in_features), dtype=jnp.float32)
    v = jax.random.normal(k_v, (batch, in_features), dtype=jnp.float32)

    # Hoisted, one-time weight re-layout (cached alongside the parameter).
    params = prepare_bilinear_params(weight, bias_u=True, bias_v=True)

    out = bilinear_forward(u, v, params)
    out = jax.block_until_ready(out)

    ref = _reference(u, v, weight, bias_u=True, bias_v=True)
    assert out.shape == (batch, out_features), out.shape
    assert jnp.allclose(out, ref, atol=1e-4, rtol=1e-4), (
        float(jnp.max(jnp.abs(out - ref)))
    )
    print("KERNEL_OK")
</pallas_src>

<mosaic_0001>
module attributes {stable_mosaic.version = 11 : i64} {
  func.func @_bilinear_kernel(%arg0: i32, %arg1: i32, %arg2: memref<8x32xf32, #tpu.memory_space<vmem>>, %arg3: memref<8x32xf32, #tpu.memory_space<vmem>>, %arg4: memref<1024x16xf32, #tpu.memory_space<vmem>>, %arg5: memref<32x16xf32, #tpu.memory_space<vmem>>, %arg6: memref<32x16xf32, #tpu.memory_space<vmem>>, %arg7: memref<1x16xf32, #tpu.memory_space<vmem>>, %arg8: memref<8x16xf32, #tpu.memory_space<vmem>>) attributes {dimension_semantics = [#tpu.dimension_semantics<parallel>, #tpu.dimension_semantics<parallel>], iteration_bounds = array<i64: 1, 1>, scalar_prefetch = 0 : i64, scratch_operands = 0 : i64, tpu.core_type = #tpu.core_type<tc>, window_params = [{transform_indices = @transform_0, window_bounds = array<i64: 8, 32>}, {transform_indices = @transform_1, window_bounds = array<i64: 8, 32>}, {transform_indices = @transform_2, window_bounds = array<i64: 1024, 16>}, {transform_indices = @transform_3, window_bounds = array<i64: 32, 16>}, {transform_indices = @transform_4, window_bounds = array<i64: 32, 16>}, {transform_indices = @transform_5, window_bounds = array<i64: 1, 16>}, {transform_indices = @transform_6, window_bounds = array<i64: 8, 16>}]} {
    %c0 = arith.constant 0 : index
    %c0_0 = arith.constant 0 : index
    %0 = vector.load %arg2[%c0, %c0_0] : memref<8x32xf32, #tpu.memory_space<vmem>>, vector<8x32xf32>
    %c0_1 = arith.constant 0 : index
    %c0_2 = arith.constant 0 : index
    %1 = vector.load %arg3[%c0_1, %c0_2] : memref<8x32xf32, #tpu.memory_space<vmem>>, vector<8x32xf32>
    %2 = vector.shape_cast %0 : vector<8x32xf32> to vector<8x32x1xf32>
    %3 = vector.shape_cast %1 : vector<8x32xf32> to vector<8x1x32xf32>
    %4 = vector.broadcast %2 : vector<8x32x1xf32> to vector<8x32x32xf32>
    %5 = vector.broadcast %3 : vector<8x1x32xf32> to vector<8x32x32xf32>
    %6 = arith.mulf %4, %5 : vector<8x32x32xf32>
    %7 = vector.shape_cast %6 : vector<8x32x32xf32> to vector<8x1024xf32>
    %c0_3 = arith.constant 0 : index
    %c0_4 = arith.constant 0 : index
    %8 = vector.load %arg4[%c0_3, %c0_4] : memref<1024x16xf32, #tpu.memory_space<vmem>>, vector<1024x16xf32>
    %cst = arith.constant dense<0.000000e+00> : vector<8x16xf32>
    %9 = tpu.matmul %7, %8, %cst {dimension_numbers = #tpu.dot_dimension_numbers<[1], [0], [0], [1], [0, 0, 1, 1], [], []>} : vector<8x1024xf32>, vector<1024x16xf32>, vector<8x16xf32> -> vector<8x16xf32>
    %c0_5 = arith.constant 0 : index
    %c0_6 = arith.constant 0 : index
    %10 = vector.load %arg6[%c0_5, %c0_6] : memref<32x16xf32, #tpu.memory_space<vmem>>, vector<32x16xf32>
    %cst_7 = arith.constant dense<0.000000e+00> : vector<8x16xf32>
    %11 = tpu.matmul %0, %10, %cst_7 {dimension_numbers = #tpu.dot_dimension_numbers<[1], [0], [0], [1], [0, 0, 1, 1], [], []>} : vector<8x32xf32>, vector<32x16xf32>, vector<8x16xf32> -> vector<8x16xf32>
    %12 = arith.addf %9, %11 : vector<8x16xf32>
    %c0_8 = arith.constant 0 : index
    %c0_9 = arith.constant 0 : index
    %13 = vector.load %arg5[%c0_8, %c0_9] : memref<32x16xf32, #tpu.memory_space<vmem>>, vector<32x16xf32>
    %cst_10 = arith.constant dense<0.000000e+00> : vector<8x16xf32>
    %14 = tpu.matmul %1, %13, %cst_10 {dimension_numbers = #tpu.dot_dimension_numbers<[1], [0], [0], [1], [0, 0, 1, 1], [], []>} : vector<8x32xf32>, vector<32x16xf32>, vector<8x16xf32> -> vector<8x16xf32>
    %15 = arith.addf %12, %14 : vector<8x16xf32>
    %c0_11 = arith.constant 0 : index
    %c0_12 = arith.constant 0 : index
    %16 = vector.load %arg7[%c0_11, %c0_12] : memref<1x16xf32, #tpu.memory_space<vmem>>, vector<1x16xf32>
    %17 = vector.broadcast %16 : vector<1x16xf32> to vector<8x16xf32>
    %18 = arith.addf %15, %17 : vector<8x16xf32>
    %c0_13 = arith.constant 0 : index
    %c0_14 = arith.constant 0 : index
    %19 = vector.load %arg8[%c0_13, %c0_14] : memref<8x16xf32, #tpu.memory_space<vmem>>, vector<8x16xf32>
    tpu.vector_store %arg8[%c0_13, %c0_14], %18 {strides = array<i32>} : memref<8x16xf32, #tpu.memory_space<vmem>>, vector<8x16xf32>,
    return
  }
  func.func @transform_0(%arg0: i32, %arg1: i32) -> (i32, i32) {
    %c0_i32 = arith.constant 0 : i32
    %c0_i32_0 = arith.constant 0 : i32
    return %arg0, %c0_i32 : i32, i32
  }
  func.func @transform_1(%arg0: i32, %arg1: i32) -> (i32, i32) {
    %c0_i32 = arith.constant 0 : i32
    %c0_i32_0 = arith.constant 0 : i32
    return %arg0, %c0_i32 : i32, i32
  }
  func.func @transform_2(%arg0: i32, %arg1: i32) -> (i32, i32) {
    %c0_i32 = arith.constant 0 : i32
    %c0_i32_0 = arith.constant 0 : i32
    return %c0_i32, %arg1 : i32, i32
  }
  func.func @transform_3(%arg0: i32, %arg1: i32) -> (i32, i32) {
    %c0_i32 = arith.constant 0 : i32
    %c0_i32_0 = arith.constant 0 : i32
    return %c0_i32, %arg1 : i32, i32
  }
  func.func @transform_4(%arg0: i32, %arg1: i32) -> (i32, i32) {
    %c0_i32 = arith.constant 0 : i32
    %c0_i32_0 = arith.constant 0 : i32
    return %c0_i32, %arg1 : i32, i32
  }
  func.func @transform_5(%arg0: i32, %arg1: i32) -> (i32, i32) {
    %c0_i32 = arith.constant 0 : i32
    %c0_i32_0 = arith.constant 0 : i32
    return %c0_i32, %arg1 : i32, i32
  }
  func.func @transform_6(%arg0: i32, %arg1: i32) -> (i32, i32) {
    %c0_i32 = arith.constant 0 : i32
    return %arg0, %arg1 : i32, i32
  }
}

</mosaic_0001>

<bundles_post_ra>
// kernel: tpu_custom_call.1
= control target key start
LH: loop header
LB: loop body
LE: loop exit
PB: predicated region body
PF: predicated region fallthrough
CT: control target
= control target key end

     0   :  { %v26_v0 = vlaneseq  ;;  %s2742_s0 = inlined_call_operand.vmem [shape: f32[8,32], index: 0, kind: input, shape index: {}]   ;;  %s2743_s1 = inlined_call_operand.vmem [shape: f32[8,32], index: 1, kind: input, shape index: {}]   ;;  %s2744_s2 = inlined_call_operand.vmem [shape: f32[1024,16], index: 2, kind: input, shape index: {}]   ;;  %s2745_s3 = inlined_call_operand.vmem [shape: f32[32,16], index: 3, kind: input, shape index: {}]   ;;  %s2746_s4 = inlined_call_operand.vmem [shape: f32[32,16], index: 4, kind: input, shape index: {}]   ;;  %s2747_s5 = inlined_call_operand.vmem [shape: f32[1,16], index: 5, kind: input, shape index: {}]   ;;  %s2748_s6 = inlined_call_operand.hbm [shape: f32[8,16], index: 6, kind: output, shape index: {}]  }
   0x1   :  { %11 = vsyncpa [#allocation3], 0  ;;  %v2014_v2 = vld [vmem:[%s2742_s0] sm:$0xff]  ;;  %v1964_v3 = vmov 1966171168   ;;  %v984_v46 = vld [vmem:[%s2744_s2 + $0x88] sm:$0xff] }
   0x2   :  { %v2009_v1 = vshrl.u32 %v26_v0, 7  ;;  %v181_v4 = vunpack.c.l.s4 %v1964_v3  ;;  %v25_v11 = vld [vmem:[%s2743_s1] sm:$0xff]  ;;  %v968_v49 = vld [vmem:[%s2744_s2 + $0x8] sm:$0xff]  ;;  %v985_v50 = vld [vmem:[%s2744_s2 + $0x90] sm:$0xff]  ;;  %v1965_v52 = vmov 0.0|0.0   ;;  %vm1966_vm0 = vmmov 0  }
   0x3   :  { %v179_v13 = vcombine.high %v25_v11, %v25_v11  ;;  %v983_v45 = vld [vmem:[%s2744_s2 + $0x80] sm:$0xff]  ;;  %v986_v51 = vld [vmem:[%s2744_s2 + $0x98] sm:$0xff]  ;;  %1728 = vmatprep.subr.bf16.mxu0 %v1965_v52  ;;  %v1967_v53 = vmov 0.0   ;;  %v969_v56 = vld [vmem:[%s2744_s2 + $0x10] sm:$0xff]  ;;  %vm940_vm1 = vcmask 261120   ;;  %s1970_s22 = smov 64  }
   0x4   :  { %v66_v5 = vsub.s32 2, %v2009_v1  ;;  %v28_v6 = vsub.s32 0, %v2009_v1  ;;  %v85_v7 = vsub.s32 3, %v2009_v1  ;;  %v47_v8 = vsub.s32 1, %v2009_v1  ;;  %v967_v47 = vld [vmem:[%s2744_s2] sm:$0xff]  ;;  %1714 = vmatprep.mubr.msk.f32.mxu0 %vm1966_vm0, %v1967_v53  ;;  %v970_v57 = vld [vmem:[%s2744_s2 + $0x18] sm:$0xff] }
   0x5   :  { %v123_v12 = vsub.s32 5, %v2009_v1  ;;  %v104_v16 = vsub.s32 4, %v2009_v1  ;;  %v182_v17 = vunpack.c.0.s8 %v181_v4  ;;  %v161_v20 = vsub.s32 7, %v2009_v1  ;;  %v987_v58 = vld [vmem:[%s2744_s2 + $0xa0] sm:$0xff]  ;;  %v988_v59 = vld [vmem:[%s2744_s2 + $0xa8] sm:$0xff]  ;;  %s1971_s23 = smov 32  }
   0x6   :  { %v67_v9 = vrot.slane %v2014_v2, %v66_v5  ;;  %v29_v10 = vrot.slane %v2014_v2, %v28_v6  ;;  %v86_v14 = vrot.slane %v2014_v2, %v85_v7  ;;  %v48_v15 = vrot.slane %v2014_v2, %v47_v8  ;;  %v1095_v60 = vld [vmem:[%s2746_s4] sm:$0xff]  ;;  %v1096_v61 = vld [vmem:[%s2746_s4 + $0x8] sm:$0xff]  ;;  %v1097_v5 = vld [vmem:[%s2746_s4 + $0x10] sm:$0xff]  ;;  %s1973_s19 = smov [#allocation2]  }
   0x7   :  { %v185_v18 = vsub.s32 %v182_v17, %v2009_v1  ;;  %v124_v19 = vrot.slane %v2014_v2, %v123_v12  ;;  %v142_v21 = vsub.s32 6, %v2009_v1  ;;  %v105_v22 = vrot.slane %v2014_v2, %v104_v16  ;;  %v971_v0 = vld [vmem:[%s2744_s2 + $0x20] sm:$0xff]  ;;  %v972_v4 = vld [vmem:[%s2744_s2 + $0x28] sm:$0xff]  ;;  %v989_v7 = vld [vmem:[%s2744_s2 + $0xb0] sm:$0xff] }
   0x8   :  { %69 = vbcast.lane.b32.xlu1 %v67_v9, 256  ;;  %31 = vbcast.lane.b32.xlu0 %v29_v10, 256  ;;  %v162_v29 = vrot.slane %v2014_v2, %v161_v20  ;;  %v1734_v48 = vpack.c.bf16 %v984_v46, %v983_v45  ;;  %v1736_v54 = vpack.c.bf16 %v968_v49, %v967_v47  ;;  %v990_v8 = vld [vmem:[%s2744_s2 + $0xb8] sm:$0xff]  ;;  %v992_v20 = vld [vmem:[%s2744_s2 + $0xc8] sm:$0xff]  ;;  %v1968_v46 = vmov 1983009808  }
   0x9   :  { %v186_v23 = vrot.slane %v25_v11, %v185_v18  ;;  %v193_v24 = vrot.slane %v179_v13, %v185_v18  ;;  %v143_v30 = vrot.slane %v2014_v2, %v142_v21  ;;  %v1738_v55 = vpack.c.bf16 %v986_v51, %v985_v50  ;;  %v1016_v11 = vld [vmem:[%s2744_s2 + $0x188] sm:$0xff]  ;;  %v973_v13 = vld [vmem:[%s2744_s2 + $0x30] sm:$0xff]  ;;  %v974_v17 = vld [vmem:[%s2744_s2 + $0x38] sm:$0xff] }
   0xa   :  { %1735 = vmatprep.subr.bf16.mxu1 %v1734_v48  ;;  %v1740_v62 = vpack.c.bf16 %v970_v57, %v969_v56  ;;  %v1729_v63 = vpack.c.bf16 %v1096_v61, %v1095_v60  ;;  %v1742_v3 = vpack.c.bf16 %v988_v59, %v987_v58  ;;  %v1744_v12 = vpack.c.bf16 %v972_v4, %v971_v0 }
   0xb   :  { %v202_v25 = vrot.slane %v186_v23, %v185_v18  ;;  %v194_v26 = vcombine.high %v186_v23, %v186_v23  ;;  %v195_v27 = vcombine.high %v193_v24, %v193_v24  ;;  %v209_v28 = vrot.slane %v193_v24, %v185_v18  ;;  %1737 = vmatpush3.bf16.msra.mxu1 %v1736_v54  ;;  %v1018_v23 = vld [vmem:[%s2744_s2 + $0x198] sm:$0xff] }
   0xc   :  { %88 = vbcast.lane.b32.xlu1 %v86_v14, 256  ;;  %50 = vbcast.lane.b32.xlu0 %v48_v15, 256  ;;  %v1746_v16 = vpack.c.bf16 %v990_v8, %v989_v7  ;;  %v303_v47 = vunpack.c.l.s4 %v1968_v46  ;;  %v1969_v49 = vmov 1934713408   ;;  %vm942_vm2 = vcmask 523264  }
   0xd   :  { %v224_v31 = vcombine.high %v202_v25, %v202_v25  ;;  %v2036_v32 = vrot.slane %v202_v25, %v28_v6  ;;  %v216_v33 = vrot.slane %v194_v26, %v185_v18  ;;  %v223_v34 = vrot.slane %v195_v27, %v185_v18  ;;  %1739 = vmatprep.subr.bf16.mxu1 %v1738_v55  ;;  %v991_v18 = vld [vmem:[%s2744_s2 + $0xc0] sm:$0xff]  ;;  %v1001_v25 = vld [vmem:[%s2744_s2 + $0x110] sm:$0xff]  ;;  %v1002_v26 = vld [vmem:[%s2744_s2 + $0x118] sm:$0xff] }
   0xe   :  { %v2038_v35 = vrot.slane %v209_v28, %v28_v6  ;;  %v225_v36 = vcombine.high %v209_v28, %v209_v28  ;;  %1730 = vmatpush3.bf16.msra.mxu0 %v1729_v63  ;;  %v1748_v27 = vpack.c.bf16 %v974_v17, %v973_v13  ;;  %v1750_v28 = vpack.c.bf16 %v992_v20, %v991_v18 }
   0xf   :  { %v2040_v37 = vrot.slane %v224_v31, %v28_v6  ;;  %v226_v38 = vcombine.high %v216_v33, %v216_v33  ;;  %v2042_v39 = vrot.slane %v216_v33, %v28_v6  ;;  %v2044_v40 = vrot.slane %v223_v34, %v28_v6  ;;  %1731 = vmatprep.subr.bf16.mxu0 %v1965_v52  ;;  %v993_v31 = vld [vmem:[%s2744_s2 + $0xd0] sm:$0xff]  ;;  %v994_v33 = vld [vmem:[%s2744_s2 + $0xd8] sm:$0xff] }
  0x10   :  { %126 = vbcast.lane.b32.xlu1 %v124_v19, 256  ;;  %107 = vbcast.lane.b32.xlu0 %v105_v22, 256  ;;  %v227_v41 = vcombine.high %v223_v34, %v223_v34  ;;  %v2046_v42 = vrot.slane %v225_v36, %v28_v6  ;;  %v1772_v34 = vpack.c.bf16 %v1002_v26, %v1001_v25  ;;  %v304_v48 = vunpack.c.0.s8 %v303_v47 }
  0x11   :  { %v2048_v43 = vrot.slane %v226_v38, %v28_v6  ;;  %1741 = vmatpush3.bf16.msra.mxu1 %v1740_v62  ;;  %v1754_v36 = vpack.c.bf16 %v994_v33, %v993_v31  ;;  %v977_v38 = vld [vmem:[%s2744_s2 + $0x50] sm:$0xff]  ;;  %v367_v50 = vunpack.c.l.s4 %v1969_v49  ;;  %v1019_v31 = vld [vmem:[%s2744_s2 + $0x1a0] sm:$0xff]  ;;  %vm944_vm3 = vcmask 785408  }
  0x12   :  { %v2050_v44 = vrot.slane %v227_v41, %v28_v6  ;;  %v1098_v6 = vld [vmem:[%s2746_s4 + $0x18] sm:$0xff]  ;;  %1743 = vmatprep.subr.bf16.mxu1 %v1742_v3  ;;  %v2167_v55 = vsub.s32 %v304_v48, %v2009_v1  ;;  %v1003_v49 = vld [vmem:[%s2744_s2 + $0x120] sm:$0xff]  ;;  %s1972_s4 = smov 96   ;;  %vm1537_vm4 = vcmask 130048  }
  0x13   :  { %v978_v41 = vld [vmem:[%s2744_s2 + $0x58] sm:$0xff]  ;;  %v368_v60 = vunpack.c.0.s8 %v367_v50  ;;  %v1004_v50 = vld [vmem:[%s2744_s2 + $0x128] sm:$0xff] }
  0x14   :  { %164 = vbcast.lane.b32.xlu1 %v162_v29, 256  ;;  %145 = vbcast.lane.b32.xlu0 %v143_v30, 256  ;;  %v1756_v45 = vpack.c.bf16 %v978_v41, %v977_v38  ;;  %v979_v38 = vld [vmem:[%s2744_s2 + $0x60] sm:$0xff]  ;;  %v980_v41 = vld [vmem:[%s2744_s2 + $0x68] sm:$0xff] }
  0x15   :  { %1745 = vmatpush3.bf16.msra.mxu1 %v1744_v12 }
  0x16   :  { %1747 = vmatprep.subr.bf16.mxu1 %v1746_v16 }
  0x18   :  { %54 = vbcast.lane.b32.xlu1 %v48_v15, 264  ;;  %35 = vbcast.lane.b32.xlu0 %v29_v10, 264 }
  0x19   :  { %1749 = vmatpush3.bf16.msra.mxu1 %v1748_v27 }
  0x1a   :  { %1751 = vmatprep.subr.bf16.mxu1 %v1750_v28 }
  0x1c   :  { %92 = vbcast.lane.b32.xlu1 %v86_v14, 264  ;;  %73 = vbcast.lane.b32.xlu0 %v67_v9, 264 }
  0x20   :  { %130 = vbcast.lane.b32.xlu1 %v124_v19, 264  ;;  %111 = vbcast.lane.b32.xlu0 %v105_v22, 264 }
  0x24   :  { %168 = vbcast.lane.b32.xlu1 %v162_v29, 264  ;;  %149 = vbcast.lane.b32.xlu0 %v143_v30, 264 }
  0x28   :  { %58 = vbcast.lane.b32.xlu1 %v48_v15, 272  ;;  %39 = vbcast.lane.b32.xlu0 %v29_v10, 272 }
  0x2c   :  { %96 = vbcast.lane.b32.xlu1 %v86_v14, 272  ;;  %77 = vbcast.lane.b32.xlu0 %v67_v9, 272 }
  0x30   :  { %134 = vbcast.lane.b32.xlu1 %v124_v19, 272  ;;  %115 = vbcast.lane.b32.xlu0 %v105_v22, 272 }
  0x34   :  { %172 = vbcast.lane.b32.xlu1 %v162_v29, 272  ;;  %153 = vbcast.lane.b32.xlu0 %v143_v30, 272 }
  0x38   :  { %62 = vbcast.lane.b32.xlu1 %v48_v15, 280  ;;  %43 = vbcast.lane.b32.xlu0 %v29_v10, 280  ;;  %v1015_v10 = vld [vmem:[%s2744_s2 + $0x180] sm:$0xff] }
  0x39   :  { %v999_v15 = vld [vmem:[%s2744_s2 + $0x100] sm:$0xff] }
  0x3c   :  { %100 = vbcast.lane.b32.xlu1 %v86_v14, 280  ;;  %81 = vbcast.lane.b32.xlu0 %v67_v9, 280  ;;  %v1732_v9 = vpack.c.bf16 %v1098_v6, %v1097_v5  ;;  %v1766_v14 = vpack.c.bf16 %v1016_v11, %v1015_v10 }
  0x3e   :  { %1733 = vmatpush3.bf16.msra.mxu0 %v1732_v9  ;;  %v2176_v9 = vsub.s32 %v368_v60, %v2009_v1 }
  0x3f   :  { %1767 = vmatprep.subr.bf16.mxu0 %v1766_v14 }
  0x40   :  { %138 = vbcast.lane.b32.xlu1 %v124_v19, 280  ;;  %119 = vbcast.lane.b32.xlu0 %v105_v22, 280  ;;  %v1000_v19 = vld [vmem:[%s2744_s2 + $0x108] sm:$0xff]  ;;  %v1017_v22 = vld [vmem:[%s2744_s2 + $0x190] sm:$0xff] }
  0x41   :  { %v1768_v21 = vpack.c.bf16 %v1000_v19, %v999_v15  ;;  %v1770_v24 = vpack.c.bf16 %v1018_v23, %v1017_v22  ;;  %1715 = vmatmul.mubr.msk.f32.vlgmr.msra.gmra.mrb[0].mxu0 %vm940_vm1, %v2014_v2 }
  0x43   :  { %1769 = vmatpush3.bf16.msra.mxu0 %v1768_v21 }
  0x44   :  { %176 = vbcast.lane.b32.xlu1 %v162_v29, 280  ;;  %157 = vbcast.lane.b32.xlu0 %v143_v30, 280  ;;  %v975_v29 = vld [vmem:[%s2744_s2 + $0x40] sm:$0xff]  ;;  %v976_v30 = vld [vmem:[%s2744_s2 + $0x48] sm:$0xff] }
  0x45   :  { %1771 = vmatprep.subr.bf16.mxu0 %v1770_v24  ;;  %v1752_v2 = vpack.c.bf16 %v976_v30, %v975_v29  ;;  %v995_v29 = vld [vmem:[%s2744_s2 + $0xe0] sm:$0xff]  ;;  %v996_v30 = vld [vmem:[%s2744_s2 + $0xe8] sm:$0xff] }
  0x47   :  { %1773 = vmatpush3.bf16.msra.mxu0 %v1772_v34  ;;  %1753 = vmatpush3.bf16.msra.mxu1 %v1752_v2  ;;  %v1758_v2 = vpack.c.bf16 %v996_v30, %v995_v29 }
  0x48   :  { %1755 = vmatprep.subr.bf16.mxu1 %v1754_v36  ;;  %v1020_v36 = vld [vmem:[%s2744_s2 + $0x1a8] sm:$0xff] }
  0x4b   :  { %1757 = vmatpush3.bf16.msra.mxu1 %v1756_v45 }
  0x4c   :  { %1759 = vmatprep.subr.bf16.mxu1 %v1758_v2 }
  0x7a   :  { %v70_v51 = vpop.permute.xlu1 %69  ;;  %v32_v54 = vpop.permute.xlu0 %31 }
  0x7b   :  { %v276_v56 = vmul.f32 %v2040_v37, %v70_v51  ;;  %v268_v57 = vmul.f32 %v2036_v32, %v32_v54  ;;  %v1774_v54 = vpack.c.bf16 %v1020_v36, %v1019_v31 }
  0x7d   :  { %v300_v58 = vcombine.low %v268_v57, %v276_v56  ;;  %v301_v59 = vcombine.high %v268_v57, %v276_v56  ;;  %v1760_v56 = vpack.c.bf16 %v980_v41, %v979_v38  ;;  %1775 = vmatprep.subr.bf16.mxu0 %v1774_v54 }
  0x7e   :  { %v89_v61 = vpop.permute.xlu1 %88  ;;  %v51_v62 = vpop.permute.xlu0 %50 }
  0x7f   :  { %v308_v63 = vrot.slane %v300_v58, %v2167_v55  ;;  %v315_v0 = vrot.slane %v301_v59, %v2167_v55  ;;  %v280_v3 = vmul.f32 %v2048_v43, %v89_v61  ;;  %v272_v4 = vmul.f32 %v2042_v39, %v51_v62  ;;  %v997_v61 = vld [vmem:[%s2744_s2 + $0xf0] sm:$0xff]  ;;  %v998_v62 = vld [vmem:[%s2744_s2 + $0xf8] sm:$0xff]  ;;  %1761 = vmatpush3.bf16.msra.mxu1 %v1760_v56 }
  0x81   :  { %v316_v5 = vcombine.low %v272_v4, %v280_v3  ;;  %v317_v6 = vcombine.high %v272_v4, %v280_v3 }
  0x82   :  { %v127_v7 = vpop.permute.xlu1 %126  ;;  %v108_v8 = vpop.permute.xlu0 %107 }
  0x83   :  { %v324_v10 = vrot.slane %v316_v5, %v2167_v55  ;;  %v331_v11 = vrot.slane %v317_v6, %v2167_v55  ;;  %v288_v16 = vmul.f32 %v2044_v40, %v127_v7  ;;  %v284_v17 = vmul.f32 %v2038_v35, %v108_v8  ;;  %v1022_v7 = vld [vmem:[%s2744_s2 + $0x1b8] sm:$0xff] }
  0x84   :  { %v1776_v5 = vpack.c.bf16 %v1004_v50, %v1003_v49  ;;  %v1762_v6 = vpack.c.bf16 %v998_v62, %v997_v61  ;;  %v982_v49 = vld [vmem:[%s2744_s2 + $0x78] sm:$0xff] }
  0x85   :  { %v364_v12 = vcombine.low %v308_v63, %v324_v10  ;;  %v365_v13 = vcombine.high %v308_v63, %v324_v10  ;;  %v380_v14 = vcombine.low %v315_v0, %v331_v11  ;;  %v381_v15 = vcombine.high %v315_v0, %v331_v11  ;;  %v1021_v63 = vld [vmem:[%s2744_s2 + $0x1b0] sm:$0xff] }
  0x86   :  { %v165_v18 = vpop.permute.xlu1 %164  ;;  %v146_v19 = vpop.permute.xlu0 %145  ;;  %1777 = vmatpush3.bf16.msra.mxu0 %v1776_v5  ;;  %1763 = vmatprep.subr.bf16.mxu1 %v1762_v6  ;;  %v1047_v6 = vld [vmem:[%s2744_s2 + $0x280] sm:$0xff] }
  0x87   :  { %v296_v20 = vmul.f32 %v2050_v44, %v165_v18  ;;  %v292_v21 = vmul.f32 %v2046_v42, %v146_v19  ;;  %v2185_v1 = vrot.slane %v365_v13, %v2176_v9  ;;  %v2188_v22 = vrot.slane %v381_v15, %v2176_v9 }
  0x88   :  { %v2191_v23 = vrot.slane %v364_v12, %v2176_v9  ;;  %v2194_v24 = vrot.slane %v380_v14, %v2176_v9  ;;  %v1778_v15 = vpack.c.bf16 %v1022_v7, %v1021_v63  ;;  %v1024_v63 = vld [vmem:[%s2744_s2 + $0x1c8] sm:$0xff] }
  0x89   :  { %v348_v25 = vcombine.low %v288_v16, %v296_v20  ;;  %v349_v26 = vcombine.high %v288_v16, %v296_v20  ;;  %v332_v27 = vcombine.low %v284_v17, %v292_v21  ;;  %v333_v28 = vcombine.high %v284_v17, %v292_v21 }
  0x8a   :  { %v55_v33 = vpop.permute.xlu1 %54  ;;  %v36_v34 = vpop.permute.xlu0 %35  ;;  %1779 = vmatprep.subr.bf16.mxu0 %v1778_v15  ;;  %v1007_v15 = vld [vmem:[%s2744_s2 + $0x140] sm:$0xff] }
  0x8b   :  { %v356_v45 = vrot.slane %v348_v25, %v2167_v55  ;;  %v363_v46 = vrot.slane %v349_v26, %v2167_v55  ;;  %v340_v47 = vrot.slane %v332_v27, %v2167_v55  ;;  %v347_v48 = vrot.slane %v333_v28, %v2167_v55 }
  0x8c   :  { %v273_v51 = vmul.f32 %v2042_v39, %v55_v33  ;;  %v269_v0 = vmul.f32 %v2036_v32, %v36_v34 }
  0x8d   :  { %v396_v57 = vcombine.low %v340_v47, %v356_v45  ;;  %v397_v58 = vcombine.high %v340_v47, %v356_v45  ;;  %v412_v59 = vcombine.low %v347_v48, %v363_v46  ;;  %v413_v60 = vcombine.high %v347_v48, %v363_v46  ;;  %v981_v48 = vld [vmem:[%s2744_s2 + $0x70] sm:$0xff] }
  0x8e   :  { %v93_v3 = vpop.permute.xlu1 %92  ;;  %v74_v4 = vpop.permute.xlu0 %73  ;;  %v1764_v5 = vpack.c.bf16 %v982_v49, %v981_v48 }
  0x8f   :  { %v281_v8 = vmul.f32 %v2048_v43, %v93_v3  ;;  %v277_v10 = vmul.f32 %v2040_v37, %v74_v4  ;;  %v411_v11 = vrot.slane %v397_v58, %v2176_v9  ;;  %v427_v12 = vrot.slane %v413_v60, %v2176_v9  ;;  %v1005_v58 = vld [vmem:[%s2744_s2 + $0x130] sm:$0xff] }
  0x90   :  { %v2243_v13 = vrot.slane %v396_v57, %v2176_v9  ;;  %v2246_v14 = vrot.slane %v412_v59, %v2176_v9  ;;  %1765 = vmatpush3.bf16.msra.mxu1 %v1764_v5 }
  0x91   :  { %v452_v16 = vcombine.low %v273_v51, %v281_v8  ;;  %v453_v17 = vcombine.high %v273_v51, %v281_v8  ;;  %v436_v18 = vcombine.low %v269_v0, %v277_v10  ;;  %v437_v19 = vcombine.high %v269_v0, %v277_v10 }
  0x92   :  { %v131_v20 = vpop.permute.xlu1 %130  ;;  %v112_v21 = vpop.permute.xlu0 %111  ;;  %v430_v25 = vcombine.low %v2185_v1, %v411_v11  ;;  %v434_v26 = vcombine.low %v2188_v22, %v427_v12  ;;  %v429_v27 = vcombine.high %v2191_v23, %v2243_v13  ;;  %v433_v28 = vcombine.high %v2194_v24, %v2246_v14 }
  0x93   :  { %v460_v29 = vrot.slane %v452_v16, %v2167_v55  ;;  %v467_v30 = vrot.slane %v453_v17, %v2167_v55  ;;  %v444_v31 = vrot.slane %v436_v18, %v2167_v55  ;;  %v451_v33 = vrot.slane %v437_v19, %v2167_v55  ;;  %v1008_v16 = vld [vmem:[%s2744_s2 + $0x148] sm:$0xff] }
  0x94   :  { %v289_v34 = vmul.f32 %v2044_v40, %v131_v20  ;;  %v285_v2 = vmul.f32 %v2038_v35, %v112_v21  ;;  %v1883_v36 = vpack.i.bf16 %v430_v25, %v434_v26  ;;  %v1878_v38 = vpack.i.bf16 %v429_v27, %v433_v28 }
  0x95   :  { %v500_v41 = vcombine.low %v444_v31, %v460_v29  ;;  %v501_v45 = vcombine.high %v444_v31, %v460_v29  ;;  %v516_v46 = vcombine.low %v451_v33, %v467_v30  ;;  %v517_v47 = vcombine.high %v451_v33, %v467_v30  ;;  %v1025_v29 = vld [vmem:[%s2744_s2 + $0x1d0] sm:$0xff]  ;;  %v1026_v30 = vld [vmem:[%s2744_s2 + $0x1d8] sm:$0xff] }
  0x96   :  { %1884 = vrot.lane.b32.xlu1 %v1883_v36, %s1970_s22  ;;  %1879 = vrot.lane.b32.xlu0 %v1878_v38, %s1971_s23  ;;  %v428_v50 = vcombine.low %v2191_v23, %v2243_v13  ;;  %v169_v51 = vpop.permute.xlu1 %168  ;;  %v150_v54 = vpop.permute.xlu0 %149  ;;  %v431_v56 = vcombine.high %v2185_v1, %v411_v11  ;;  %v435_v57 = vcombine.high %v2188_v22, %v427_v12  ;;  %v1006_v1 = vld [vmem:[%s2744_s2 + $0x138] sm:$0xff]  ;;  %v1023_v22 = vld [vmem:[%s2744_s2 + $0x1c0] sm:$0xff] }
  0x97   :  { %v297_v59 = vmul.f32 %v2050_v44, %v169_v51  ;;  %v293_v60 = vmul.f32 %v2046_v42, %v150_v54  ;;  %v2278_v61 = vrot.slane %v501_v45, %v2176_v9  ;;  %v2281_v62 = vrot.slane %v517_v47, %v2176_v9  ;;  %v1048_v12 = vld [vmem:[%s2744_s2 + $0x288] sm:$0xff]  ;;  %v1010_v45 = vld [vmem:[%s2744_s2 + $0x158] sm:$0xff] }
  0x98   :  { %v1888_v0 = vpack.i.bf16 %v431_v56, %v435_v57  ;;  %v2293_v3 = vrot.slane %v500_v41, %v2176_v9  ;;  %v2296_v4 = vrot.slane %v516_v46, %v2176_v9  ;;  %v1780_v19 = vpack.c.bf16 %v1006_v1, %v1005_v58  ;;  %v1027_v46 = vld [vmem:[%s2744_s2 + $0x1e0] sm:$0xff]  ;;  %v1028_v47 = vld [vmem:[%s2744_s2 + $0x1e8] sm:$0xff]  ;;  %v1050_v23 = vld [vmem:[%s2744_s2 + $0x298] sm:$0xff] }
  0x99   :  { %v484_v7 = vcombine.low %v289_v34, %v297_v59  ;;  %v485_v8 = vcombine.high %v289_v34, %v297_v59  ;;  %v468_v10 = vcombine.low %v285_v2, %v293_v60  ;;  %v469_v11 = vcombine.high %v285_v2, %v293_v60  ;;  %v1009_v34 = vld [vmem:[%s2744_s2 + $0x150] sm:$0xff] }
  0x9a   :  { %1889 = vrot.lane.b32.xlu0 %v1888_v0, %s1972_s4  ;;  %v59_v17 = vpop.permute.xlu1 %58  ;;  %v40_v18 = vpop.permute.xlu0 %39  ;;  %v432_v20 = vcombine.low %v2194_v24, %v2246_v14  ;;  %v1782_v21 = vpack.c.bf16 %v1024_v63, %v1023_v22  ;;  %1781 = vmatpush3.bf16.msra.mxu0 %v1780_v19  ;;  %v1798_v31 = vpack.c.bf16 %v1048_v12, %v1047_v6  ;;  %v1049_v24 = vld [vmem:[%s2744_s2 + $0x290] sm:$0xff] }
  0x9b   :  { %v492_v25 = vrot.slane %v484_v7, %v2167_v55  ;;  %v499_v26 = vrot.slane %v485_v8, %v2167_v55  ;;  %v476_v27 = vrot.slane %v468_v10, %v2167_v55  ;;  %v483_v28 = vrot.slane %v469_v11, %v2167_v55 }
  0x9c   :  { %v1784_v33 = vpack.c.bf16 %v1008_v16, %v1007_v15  ;;  %1783 = vmatprep.subr.bf16.mxu0 %v1782_v21  ;;  %v274_v48 = vmul.f32 %v2042_v39, %v59_v17  ;;  %v270_v49 = vmul.f32 %v2036_v32, %v40_v18  ;;  %1799 = vmatprep.subr.bf16.mxu1 %v1798_v31 }
  0x9d   :  { %v532_v2 = vcombine.low %v476_v27, %v492_v25  ;;  %v533_v36 = vcombine.high %v476_v27, %v492_v25  ;;  %v548_v38 = vcombine.low %v483_v28, %v499_v26  ;;  %v549_v41 = vcombine.high %v483_v28, %v499_v26 }
  0x9e   :  { %v97_v51 = vpop.permute.xlu1 %96  ;;  %v78_v54 = vpop.permute.xlu0 %77  ;;  %v1786_v56 = vpack.c.bf16 %v1026_v30, %v1025_v29  ;;  %1785 = vmatpush3.bf16.msra.mxu0 %v1784_v33  ;;  %v1788_v63 = vpack.c.bf16 %v1010_v45, %v1009_v34  ;;  %v1790_v0 = vpack.c.bf16 %v1028_v47, %v1027_v46  ;;  %v1011_v47 = vld [vmem:[%s2744_s2 + $0x160] sm:$0xff] }
  0x9f   :  { %v282_v57 = vmul.f32 %v2048_v43, %v97_v51  ;;  %v278_v58 = vmul.f32 %v2040_v37, %v78_v54  ;;  %v547_v59 = vrot.slane %v533_v36, %v2176_v9  ;;  %v563_v60 = vrot.slane %v549_v41, %v2176_v9 }
  0xa0   :  { %v2342_v1 = vrot.slane %v532_v2, %v2176_v9  ;;  %v2345_v22 = vrot.slane %v548_v38, %v2176_v9  ;;  %1787 = vmatprep.subr.bf16.mxu0 %v1786_v56  ;;  %v1030_v56 = vld [vmem:[%s2744_s2 + $0x1f8] sm:$0xff] }
  0xa1   :  { %v588_v5 = vcombine.low %v274_v48, %v282_v57  ;;  %v589_v6 = vcombine.high %v274_v48, %v282_v57  ;;  %v572_v7 = vcombine.low %v270_v49, %v278_v58  ;;  %v573_v8 = vcombine.high %v270_v49, %v278_v58 }
  0xa2   :  { %v135_v10 = vpop.permute.xlu1 %134  ;;  %v116_v11 = vpop.permute.xlu0 %115  ;;  %v566_v12 = vcombine.low %v2278_v61, %v547_v59  ;;  %v570_v15 = vcombine.low %v2281_v62, %v563_v60  ;;  %v565_v16 = vcombine.high %v2293_v3, %v2342_v1  ;;  %v568_v17 = vcombine.low %v2296_v4, %v2345_v22  ;;  %1789 = vmatpush3.bf16.msra.mxu0 %v1788_v63 }
  0xa3   :  { %v596_v18 = vrot.slane %v588_v5, %v2167_v55  ;;  %v603_v19 = vrot.slane %v589_v6, %v2167_v55  ;;  %v580_v21 = vrot.slane %v572_v7, %v2167_v55  ;;  %v587_v25 = vrot.slane %v573_v8, %v2167_v55  ;;  %1791 = vmatprep.subr.bf16.mxu0 %v1790_v0  ;;  %v1013_v6 = vld [vmem:[%s2744_s2 + $0x170] sm:$0xff]  ;;  %v1014_v7 = vld [vmem:[%s2744_s2 + $0x178] sm:$0xff] }
  0xa4   :  { %v290_v26 = vmul.f32 %v2044_v40, %v135_v10  ;;  %v286_v27 = vmul.f32 %v2038_v35, %v116_v11  ;;  %v1898_v28 = vpack.i.bf16 %v566_v12, %v570_v15  ;;  %v569_v29 = vcombine.high %v2296_v4, %v2345_v22  ;;  %v1082_v4 = vld [vmem:[%s2744_s2 + $0x398] sm:$0xff] }
  0xa5   :  { %v636_v30 = vcombine.low %v580_v21, %v596_v18  ;;  %v637_v31 = vcombine.high %v580_v21, %v596_v18  ;;  %v652_v33 = vcombine.low %v587_v25, %v603_v19  ;;  %v653_v34 = vcombine.high %v587_v25, %v603_v19  ;;  %v1079_v21 = vld [vmem:[%s2744_s2 + $0x380] sm:$0xff]  ;;  %v1080_v25 = vld [vmem:[%s2744_s2 + $0x388] sm:$0xff] }
  0xa6   :  { %1899 = vrot.lane.b32.xlu0 %v1898_v28, %s1970_s22  ;;  %v1893_v2 = vpack.i.bf16 %v565_v16, %v569_v29  ;;  %v564_v36 = vcombine.low %v2293_v3, %v2342_v1  ;;  %v173_v38 = vpop.permute.xlu1 %172  ;;  %v154_v41 = vpop.permute.xlu0 %153  ;;  %v567_v45 = vcombine.high %v2278_v61, %v547_v59  ;;  %v571_v46 = vcombine.high %v2281_v62, %v563_v60  ;;  %v1012_v61 = vld [vmem:[%s2744_s2 + $0x168] sm:$0xff]  ;;  %v1029_v62 = vld [vmem:[%s2744_s2 + $0x1f0] sm:$0xff] }
  0xa7   :  { %v298_v48 = vmul.f32 %v2050_v44, %v173_v38  ;;  %v294_v49 = vmul.f32 %v2046_v42, %v154_v41  ;;  %v2372_v51 = vrot.slane %v637_v31, %v2176_v9  ;;  %v2375_v54 = vrot.slane %v653_v34, %v2176_v9  ;;  %v1081_v3 = vld [vmem:[%s2744_s2 + $0x390] sm:$0xff] }
  0xa8   :  { %1894 = vrot.lane.b32.xlu1 %v1893_v2, %s1971_s23  ;;  %v1903_v57 = vpack.i.bf16 %v567_v45, %v571_v46  ;;  %v2388_v58 = vrot.slane %v636_v30, %v2176_v9  ;;  %v2391_v59 = vrot.slane %v652_v33, %v2176_v9  ;;  %v1792_v11 = vpack.c.bf16 %v1012_v61, %v1011_v47 }
  0xa9   :  { %v620_v60 = vcombine.low %v290_v26, %v298_v48  ;;  %v621_v63 = vcombine.high %v290_v26, %v298_v48  ;;  %v604_v0 = vcombine.low %v286_v27, %v294_v49  ;;  %v605_v5 = vcombine.high %v286_v27, %v294_v49 }
  0xaa   :  { %v63_v8 = vpop.permute.xlu1 %62  ;;  %v44_v10 = vpop.permute.xlu0 %43  ;;  %v1794_v12 = vpack.c.bf16 %v1030_v56, %v1029_v62  ;;  %1793 = vmatpush3.bf16.msra.mxu0 %v1792_v11  ;;  %v1796_v26 = vpack.c.bf16 %v1014_v7, %v1013_v6  ;;  %v1830_v38 = vpack.c.bf16 %v1080_v25, %v1079_v21 }
  0xab   :  { %v628_v15 = vrot.slane %v620_v60, %v2167_v55  ;;  %v635_v16 = vrot.slane %v621_v63, %v2167_v55  ;;  %v612_v18 = vrot.slane %v604_v0, %v2167_v55  ;;  %v619_v19 = vrot.slane %v605_v5, %v2167_v55 }
  0xac   :  { %1904 = vrot.lane.b32.xlu1 %v1903_v57, %s1972_s4  ;;  %1795 = vmatprep.subr.bf16.mxu0 %v1794_v12  ;;  %v275_v31 = vmul.f32 %v2042_v39, %v63_v8  ;;  %v271_v33 = vmul.f32 %v2036_v32, %v44_v10 }
  0xad   :  { %v668_v27 = vcombine.low %v612_v18, %v628_v15  ;;  %v669_v28 = vcombine.high %v612_v18, %v628_v15  ;;  %v684_v29 = vcombine.low %v619_v19, %v635_v16  ;;  %v685_v30 = vcombine.high %v619_v19, %v635_v16 }
  0xae   :  { %v101_v34 = vpop.permute.xlu1 %100  ;;  %v82_v2 = vpop.permute.xlu0 %81  ;;  %1797 = vmatpush3.bf16.msra.mxu0 %v1796_v26 }
  0xaf   :  { %v283_v41 = vmul.f32 %v2048_v43, %v101_v34  ;;  %v279_v45 = vmul.f32 %v2040_v37, %v82_v2  ;;  %v683_v46 = vrot.slane %v669_v28, %v2176_v9  ;;  %v699_v47 = vrot.slane %v685_v30, %v2176_v9  ;;  %1831 = vmatprep.subr.bf16.mxu0 %v1830_v38 }
  0xb0   :  { %v2417_v48 = vrot.slane %v668_v27, %v2176_v9  ;;  %v2420_v49 = vrot.slane %v684_v29, %v2176_v9 }
  0xb1   :  { %v724_v39 = vcombine.low %v275_v31, %v283_v41  ;;  %v725_v32 = vcombine.high %v275_v31, %v283_v41  ;;  %v708_v61 = vcombine.low %v271_v33, %v279_v45  ;;  %v709_v62 = vcombine.high %v271_v33, %v279_v45 }
  0xb2   :  { %v139_v56 = vpop.permute.xlu1 %138  ;;  %v120_v43 = vpop.permute.xlu0 %119  ;;  %v702_v37 = vcombine.low %v2372_v51, %v683_v46  ;;  %v706_v57 = vcombine.low %v2375_v54, %v699_v47  ;;  %v701_v60 = vcombine.high %v2388_v58, %v2417_v48  ;;  %v704_v63 = vcombine.low %v2391_v59, %v2420_v49 }
  0xb3   :  { %v732_v0 = vrot.slane %v724_v39, %v2167_v55  ;;  %v739_v5 = vrot.slane %v725_v32, %v2167_v55  ;;  %v716_v6 = vrot.slane %v708_v61, %v2167_v55  ;;  %v723_v7 = vrot.slane %v709_v62, %v2167_v55 }
  0xb4   :  { %v291_v8 = vmul.f32 %v2044_v40, %v139_v56  ;;  %v287_v10 = vmul.f32 %v2038_v35, %v120_v43  ;;  %v1913_v11 = vpack.i.bf16 %v702_v37, %v706_v57  ;;  %v705_v12 = vcombine.high %v2391_v59, %v2420_v49  ;;  %v1089_v59 = vld [vmem:[%s2744_s2 + $0x3d0] sm:$0xff]  ;;  %v1090_v49 = vld [vmem:[%s2744_s2 + $0x3d8] sm:$0xff] }
  0xb5   :  { %v772_v15 = vcombine.low %v716_v6, %v732_v0  ;;  %v773_v16 = vcombine.high %v716_v6, %v732_v0  ;;  %v788_v18 = vcombine.low %v723_v7, %v739_v5  ;;  %v789_v19 = vcombine.high %v723_v7, %v739_v5 }
  0xb6   :  { %1914 = vrot.lane.b32.xlu1 %v1913_v11, %s1970_s22  ;;  %v1908_v21 = vpack.i.bf16 %v701_v60, %v705_v12  ;;  %v700_v25 = vcombine.low %v2388_v58, %v2417_v48  ;;  %v177_v26 = vpop.permute.xlu1 %176  ;;  %v158_v27 = vpop.permute.xlu0 %157  ;;  %v703_v40 = vcombine.high %v2372_v51, %v683_v46  ;;  %v707_v35 = vcombine.high %v2375_v54, %v699_v47  ;;  %v1453_v58 = vld [vmem:[%s2745_s3 + $0x8] sm:$0xff] }
  0xb7   :  { %v299_v28 = vmul.f32 %v2050_v44, %v177_v26  ;;  %v295_v29 = vmul.f32 %v2046_v42, %v158_v27  ;;  %v787_v30 = vrot.slane %v773_v16, %v2176_v9  ;;  %v803_v31 = vrot.slane %v789_v19, %v2176_v9 }
  0xb8   :  { %1909 = vrot.lane.b32.xlu0 %v1908_v21, %s1971_s23  ;;  %v1918_v33 = vpack.i.bf16 %v703_v40, %v707_v35  ;;  %v2447_v34 = vrot.slane %v772_v15, %v2176_v9  ;;  %v2450_v2 = vrot.slane %v788_v18, %v2176_v9  ;;  %v1031_v40 = vld [vmem:[%s2744_s2 + $0x200] sm:$0xff]  ;;  %v1032_v35 = vld [vmem:[%s2744_s2 + $0x208] sm:$0xff] }
  0xb9   :  { %v756_v51 = vcombine.low %v291_v8, %v299_v28  ;;  %v757_v38 = vcombine.high %v291_v8, %v299_v28  ;;  %v740_v54 = vcombine.low %v287_v10, %v295_v29  ;;  %v741_v41 = vcombine.high %v287_v10, %v295_v29 }
  0xba   :  { %v1800_v29 = vpack.c.bf16 %v1032_v35, %v1031_v40  ;;  %v1064_v40 = vld [vmem:[%s2744_s2 + $0x308] sm:$0xff] }
  0xbb   :  { %v764_v44 = vrot.slane %v756_v51, %v2167_v55  ;;  %v771_v42 = vrot.slane %v757_v38, %v2167_v55  ;;  %v748_v45 = vrot.slane %v740_v54, %v2167_v55  ;;  %v755_v46 = vrot.slane %v741_v41, %v2167_v55  ;;  %v1033_v51 = vld [vmem:[%s2744_s2 + $0x210] sm:$0xff]  ;;  %v1034_v38 = vld [vmem:[%s2744_s2 + $0x218] sm:$0xff]  ;;  %v1051_v54 = vld [vmem:[%s2744_s2 + $0x2a0] sm:$0xff] }
  0xbc   :  { %1919 = vrot.lane.b32.xlu0 %v1918_v33, %s1972_s4  ;;  %v1802_v33 = vpack.c.bf16 %v1050_v23, %v1049_v24  ;;  %v1052_v41 = vld [vmem:[%s2744_s2 + $0x2a8] sm:$0xff]  ;;  %v1042_v24 = vld [vmem:[%s2744_s2 + $0x258] sm:$0xff] }
  0xbd   :  { %v804_v47 = vcombine.low %v748_v45, %v764_v44  ;;  %v805_v39 = vcombine.high %v748_v45, %v764_v44  ;;  %v820_v32 = vcombine.low %v755_v46, %v771_v42  ;;  %v821_v61 = vcombine.high %v755_v46, %v771_v42  ;;  %v1035_v45 = vld [vmem:[%s2744_s2 + $0x220] sm:$0xff]  ;;  %v1036_v46 = vld [vmem:[%s2744_s2 + $0x228] sm:$0xff] }
  0xbe   :  { %v1804_v44 = vpack.c.bf16 %v1034_v38, %v1033_v51  ;;  %v1806_v42 = vpack.c.bf16 %v1052_v41, %v1051_v54  ;;  %v1066_v51 = vld [vmem:[%s2744_s2 + $0x318] sm:$0xff]  ;;  %v1083_v54 = vld [vmem:[%s2744_s2 + $0x3a0] sm:$0xff]  ;;  %v1084_v41 = vld [vmem:[%s2744_s2 + $0x3a8] sm:$0xff] }
  0xbf   :  { %v819_v62 = vrot.slane %v805_v39, %v2176_v9  ;;  %v835_v56 = vrot.slane %v821_v61, %v2176_v9  ;;  %v2460_v43 = vrot.slane %v804_v47, %v2176_v9  ;;  %v2463_v37 = vrot.slane %v820_v32, %v2176_v9  ;;  %v1053_v47 = vld [vmem:[%s2744_s2 + $0x2b0] sm:$0xff]  ;;  %v1054_v39 = vld [vmem:[%s2744_s2 + $0x2b8] sm:$0xff] }
  0xc0   :  { %v1808_v32 = vpack.c.bf16 %v1036_v46, %v1035_v45  ;;  %v1810_v61 = vpack.c.bf16 %v1054_v39, %v1053_v47  ;;  %v1044_v45 = vld [vmem:[%s2744_s2 + $0x268] sm:$0xff]  ;;  %v1061_v47 = vld [vmem:[%s2744_s2 + $0x2f0] sm:$0xff]  ;;  %v1062_v39 = vld [vmem:[%s2744_s2 + $0x2f8] sm:$0xff] }
  0xc1   :  { %v838_v57 = vcombine.low %v787_v30, %v819_v62  ;;  %v842_v60 = vcombine.low %v803_v31, %v835_v56  ;;  %v837_v55 = vcombine.high %v2447_v34, %v2460_v43  ;;  %v840_v0 = vcombine.low %v2450_v2, %v2463_v37 }
  0xc2   :  { %v841_v5 = vcombine.high %v2450_v2, %v2463_v37  ;;  %v836_v6 = vcombine.low %v2447_v34, %v2460_v43  ;;  %v839_v7 = vcombine.high %v787_v30, %v819_v62  ;;  %v843_v8 = vcombine.high %v803_v31, %v835_v56  ;;  %v1037_v62 = vld [vmem:[%s2744_s2 + $0x230] sm:$0xff]  ;;  %v1038_v56 = vld [vmem:[%s2744_s2 + $0x238] sm:$0xff] }
  0xc3   :  { %v1928_v10 = vpack.i.bf16 %v838_v57, %v842_v60  ;;  %v1055_v57 = vld [vmem:[%s2744_s2 + $0x2c0] sm:$0xff]  ;;  %v1056_v60 = vld [vmem:[%s2744_s2 + $0x2c8] sm:$0xff] }
  0xc4   :  { %v1923_v11 = vpack.i.bf16 %v837_v55, %v841_v5  ;;  %v1933_v9 = vpack.i.bf16 %v839_v7, %v843_v8  ;;  %v1812_v7 = vpack.c.bf16 %v1038_v56, %v1037_v62  ;;  %v1068_v62 = vld [vmem:[%s2744_s2 + $0x328] sm:$0xff] }
  0xc5   :  { %1929 = vrot.lane.b32.xlu0 %v1928_v10, %s1970_s22  ;;  %s1545_s22 = sshll.u32 %s1973_s19, 4  ;;  %s1546_s22 = int_to_ptr.vmem [resolvable:$true] %s1545_s22 }
  0xc6   :  { %1924 = vrot.lane.b32.xlu1 %v1923_v11, %s1971_s23  ;;  %v1814_v11 = vpack.c.bf16 %v1056_v60, %v1055_v57  ;;  %v1085_v57 = vld [vmem:[%s2744_s2 + $0x3b0] sm:$0xff]  ;;  %v1086_v60 = vld [vmem:[%s2744_s2 + $0x3b8] sm:$0xff]  ;;  %s1940_s23 = scalar_lea.vmem %s1546_s22, 128  ;;  %p1945_p1 = scmp.lt.s32.totalorder %s1546_s22, %s1546_s22 }
  0xc7   :  { %p1941_p0 = scmp.ne.s32.totalorder %s1546_s22, %s1940_s23  ;;  %p1946_p2 = scmp.lt.s32.totalorder %s1940_s23, %s1940_s23 }
  0xc9   :  { %p1947_p3 = por %p1946_p2, %p1945_p1 }
  0xca   :  { %1934 = vrot.lane.b32.xlu1 %v1933_v9, %s1972_s4  ;;  %v1039_v9 = vld [vmem:[%s2744_s2 + $0x240] sm:$0xff] }
  0xcb   :  { %p1948_p4 = pnand %p1947_p3, %p1941_p0 }
 0x108   :  { %v1885_v12 = vpop.permute.xlu1 %1884  ;;  %v1880_v15 = vpop.permute.xlu0 %1879 }
 0x109   :  { %v1882_v16 = vunpack.i.h.bf16 %v1880_v15  ;;  %v1881_v18 = vunpack.i.l.bf16 %v1880_v15  ;;  %v1887_v19 = vunpack.i.h.bf16 %v1885_v12  ;;  %v1886_v21 = vunpack.i.l.bf16 %v1885_v12  ;;  %v1040_v12 = vld [vmem:[%s2744_s2 + $0x248] sm:$0xff] }
 0x10b   :  { %v946_v26 = vsel %vm940_vm1, %v432_v20, %v1881_v18  ;;  %v941_v27 = vsel %vm940_vm1, %v428_v50, %v1882_v16  ;;  %v1057_v18 = vld [vmem:[%s2744_s2 + $0x2d0] sm:$0xff] }
 0x10c   :  { %v1890_v28 = vpop.permute.xlu0 %1889  ;;  %v947_v50 = vsel %vm942_vm2, %v946_v26, %v1886_v21  ;;  %v943_v20 = vsel %vm942_vm2, %v941_v27, %v1887_v19  ;;  %v1058_v19 = vld [vmem:[%s2744_s2 + $0x2d8] sm:$0xff]  ;;  %v1063_v27 = vld [vmem:[%s2744_s2 + $0x300] sm:$0xff] }
 0x10d   :  { %v1892_v13 = vunpack.i.h.bf16 %v1890_v28  ;;  %v1891_v14 = vunpack.i.l.bf16 %v1890_v28  ;;  %v1816_v28 = vpack.c.bf16 %v1040_v12, %v1039_v9  ;;  %v1069_v9 = vld [vmem:[%s2744_s2 + $0x330] sm:$0xff]  ;;  %v1070_v12 = vld [vmem:[%s2744_s2 + $0x338] sm:$0xff] }
 0x10f   :  { %v948_v30 = vsel %vm944_vm3, %v947_v50, %v1891_v14  ;;  %v945_v31 = vsel %vm944_vm3, %v943_v20, %v1892_v13  ;;  %v1832_v14 = vpack.c.bf16 %v1064_v40, %v1063_v27  ;;  %v1059_v50 = vld [vmem:[%s2744_s2 + $0x2e0] sm:$0xff]  ;;  %v1060_v20 = vld [vmem:[%s2744_s2 + $0x2e8] sm:$0xff] }
 0x110   :  { %1236 = vmatprep.mubr.f32.mxu1 %v948_v30 }
 0x111   :  { %1237 = vmatmul.mubr.f32.vlgmr.msra.gmra.mrb[0].mxu1 %v945_v31  ;;  %v1834_v31 = vpack.c.bf16 %v1082_v4, %v1081_v3  ;;  %v1844_v3 = vpack.c.bf16 %v1070_v12, %v1069_v9  ;;  %v1071_v4 = vld [vmem:[%s2744_s2 + $0x340] sm:$0xff] }
 0x112   :  { %1801 = vmatpush3.bf16.msra.mxu1 %v1800_v29 }
 0x113   :  { %1803 = vmatprep.subr.bf16.mxu1 %v1802_v33  ;;  %v1065_v33 = vld [vmem:[%s2744_s2 + $0x310] sm:$0xff] }
 0x114   :  { %v1836_v46 = vpack.c.bf16 %v1066_v51, %v1065_v33  ;;  %v1074_v33 = vld [vmem:[%s2744_s2 + $0x358] sm:$0xff]  ;;  %v1454_v51 = vld [vmem:[%s2745_s3 + $0x10] sm:$0xff] }
 0x116   :  { %1805 = vmatpush3.bf16.msra.mxu1 %v1804_v44  ;;  %v1822_v44 = vpack.c.bf16 %v1060_v20, %v1059_v50  ;;  %v1073_v50 = vld [vmem:[%s2744_s2 + $0x350] sm:$0xff] }
 0x117   :  { %1807 = vmatprep.subr.bf16.mxu1 %v1806_v42  ;;  %v1043_v42 = vld [vmem:[%s2744_s2 + $0x260] sm:$0xff] }
 0x118   :  { %v1900_v55 = vpop.permute.xlu0 %1899  ;;  %v1824_v56 = vpack.c.bf16 %v1044_v45, %v1043_v42 }
 0x119   :  { %v1902_v15 = vunpack.i.h.bf16 %v1900_v55  ;;  %v1901_v16 = vunpack.i.l.bf16 %v1900_v55  ;;  %v1826_v55 = vpack.c.bf16 %v1062_v39, %v1061_v47  ;;  %v1076_v47 = vld [vmem:[%s2744_s2 + $0x368] sm:$0xff]  ;;  %v1093_v39 = vld [vmem:[%s2744_s2 + $0x3f0] sm:$0xff] }
 0x11a   :  { %v1895_v5 = vpop.permute.xlu1 %1894  ;;  %1809 = vmatpush3.bf16.msra.mxu1 %v1808_v32  ;;  %v1838_v32 = vpack.c.bf16 %v1084_v41, %v1083_v54  ;;  %v1091_v54 = vld [vmem:[%s2744_s2 + $0x3e0] sm:$0xff]  ;;  %v1092_v41 = vld [vmem:[%s2744_s2 + $0x3e8] sm:$0xff] }
 0x11b   :  { %v1897_v8 = vunpack.i.h.bf16 %v1895_v5  ;;  %v1896_v10 = vunpack.i.l.bf16 %v1895_v5  ;;  %1811 = vmatprep.subr.bf16.mxu1 %v1810_v61  ;;  %v1067_v61 = vld [vmem:[%s2744_s2 + $0x320] sm:$0xff]  ;;  %v1045_v5 = vld [vmem:[%s2744_s2 + $0x270] sm:$0xff]  ;;  %v1854_v45 = vpack.c.bf16 %v1092_v41, %v1091_v54 }
 0x11d   :  { %v949_v21 = vsel %vm940_vm1, %v564_v36, %v1897_v8  ;;  %v952_v26 = vsel %vm940_vm1, %v568_v17, %v1896_v10  ;;  %v1818_v17 = vpack.c.bf16 %v1058_v19, %v1057_v18  ;;  %v1041_v36 = vld [vmem:[%s2744_s2 + $0x250] sm:$0xff]  ;;  %v1840_v8 = vpack.c.bf16 %v1068_v62, %v1067_v61  ;;  %v1087_v18 = vld [vmem:[%s2744_s2 + $0x3c0] sm:$0xff]  ;;  %v1088_v19 = vld [vmem:[%s2744_s2 + $0x3c8] sm:$0xff] }
 0x11e   :  { %v1905_v35 = vpop.permute.xlu1 %1904  ;;  %1813 = vmatpush3.bf16.msra.mxu1 %v1812_v7  ;;  %v953_v23 = vsel %vm942_vm2, %v952_v26, %v1901_v16  ;;  %v950_v13 = vsel %vm942_vm2, %v949_v21, %v1902_v15  ;;  %v1820_v38 = vpack.c.bf16 %v1042_v24, %v1041_v36  ;;  %v1046_v7 = vld [vmem:[%s2744_s2 + $0x278] sm:$0xff]  ;;  %v2638_v21 = vpop.f32.mrb[0].mxu0  ;;  %v1072_v36 = vld [vmem:[%s2744_s2 + $0x348] sm:$0xff]  ;;  %v1452_v24 = vld [vmem:[%s2745_s3] sm:$0xff] }
 0x11f   :  { %v1907_v1 = vunpack.i.h.bf16 %v1905_v35  ;;  %v1906_v22 = vunpack.i.l.bf16 %v1905_v35  ;;  %1815 = vmatprep.subr.bf16.mxu1 %v1814_v11  ;;  %v1842_v11 = vpack.c.bf16 %v1086_v60, %v1085_v57  ;;  %v1828_v16 = vpack.c.bf16 %v1046_v7, %v1045_v5  ;;  %v1716_v40 = vpop.f32.mrb[1].mxu0  ;;  %v1078_v5 = vld [vmem:[%s2744_s2 + $0x378] sm:$0xff] }
 0x120   :  { %v1863_v20 = vpack.c.bf16 %v1453_v58, %v1452_v24 }
 0x121   :  { %v954_v29 = vsel %vm944_vm3, %v953_v23, %v1906_v22  ;;  %v951_v30 = vsel %vm944_vm3, %v950_v13, %v1907_v1 }
 0x122   :  { %1306 = vmatprep.mubr.f32.mxu0 %v954_v29  ;;  %1817 = vmatpush3.bf16.msra.mxu1 %v1816_v28 }
 0x123   :  { %1307 = vmatmul.mubr.f32.vlgmr.msra.gmra.mrb[2].mxu0 %v951_v30  ;;  %1819 = vmatprep.subr.bf16.mxu1 %v1818_v17  ;;  %v1846_v17 = vpack.c.bf16 %v1088_v19, %v1087_v18 }
 0x124   :  { %1833 = vmatpush3.bf16.msra.mxu0 %v1832_v14  ;;  %v1848_v14 = vpack.c.bf16 %v1072_v36, %v1071_v4 }
 0x125   :  { %1835 = vmatprep.subr.bf16.mxu0 %v1834_v31  ;;  %v1850_v31 = vpack.c.bf16 %v1090_v49, %v1089_v59  ;;  %v1555_v59 = vld [vmem:[%s2747_s5] ss:$0 sm:$0xff] }
 0x126   :  { %1821 = vmatpush3.bf16.msra.mxu1 %v1820_v38  ;;  %v1455_v38 = vld [vmem:[%s2745_s3 + $0x18] sm:$0xff] }
 0x127   :  { %1823 = vmatprep.subr.bf16.mxu1 %v1822_v44  ;;  %v1852_v44 = vpack.c.bf16 %v1074_v33, %v1073_v50  ;;  %v1866_v42 = vpack.c.bf16 %v1455_v38, %v1454_v51 }
 0x128   :  { %1837 = vmatpush3.bf16.msra.mxu0 %v1836_v46  ;;  %v1915_v10 = vpop.permute.xlu1 %1914  ;;  %v1075_v46 = vld [vmem:[%s2744_s2 + $0x360] sm:$0xff] }
 0x129   :  { %1839 = vmatprep.subr.bf16.mxu0 %v1838_v32  ;;  %v1917_v35 = vunpack.i.h.bf16 %v1915_v10  ;;  %v1916_v28 = vunpack.i.l.bf16 %v1915_v10  ;;  %v1094_v32 = vld [vmem:[%s2744_s2 + $0x3f8] sm:$0xff]  ;;  %v1939_v10 = vld [vmem:[%s2743_s1] sm:$0xff] }
 0x12a   :  { %v1910_v15 = vpop.permute.xlu0 %1909  ;;  %1825 = vmatpush3.bf16.msra.mxu1 %v1824_v56  ;;  %v1856_v56 = vpack.c.bf16 %v1076_v47, %v1075_v46 }
 0x12b   :  { %v1912_v26 = vunpack.i.h.bf16 %v1910_v15  ;;  %v1911_v27 = vunpack.i.l.bf16 %v1910_v15  ;;  %1827 = vmatprep.subr.bf16.mxu1 %v1826_v55  ;;  %v1077_v55 = vld [vmem:[%s2744_s2 + $0x370] sm:$0xff] }
 0x12c   :  { %1841 = vmatpush3.bf16.msra.mxu0 %v1840_v8  ;;  %v1860_v12 = vpack.c.bf16 %v1078_v5, %v1077_v55 }
 0x12d   :  { %v955_v1 = vsel %vm940_vm1, %v700_v25, %v1912_v26  ;;  %1843 = vmatprep.subr.bf16.mxu0 %v1842_v11  ;;  %v958_v22 = vsel %vm940_vm1, %v704_v63, %v1911_v27 }
 0x12e   :  { %v1920_v48 = vpop.permute.xlu0 %1919  ;;  %1829 = vmatpush3.bf16.msra.mxu1 %v1828_v16  ;;  %v959_v23 = vsel %vm942_vm2, %v958_v22, %v1916_v28  ;;  %v956_v13 = vsel %vm942_vm2, %v955_v1, %v1917_v35 }
 0x12f   :  { %v1922_v63 = vunpack.i.h.bf16 %v1920_v48  ;;  %v1921_v25 = vunpack.i.l.bf16 %v1920_v48  ;;  %1862 = vmatprep.subr.bf16.mxu1 %v1965_v52 }
 0x130   :  { %1845 = vmatpush3.bf16.msra.mxu0 %v1844_v3 }
 0x131   :  { %v960_v29 = vsel %vm944_vm3, %v959_v23, %v1921_v25  ;;  %v957_v30 = vsel %vm944_vm3, %v956_v13, %v1922_v63  ;;  %1847 = vmatprep.subr.bf16.mxu0 %v1846_v17 }
 0x132   :  { %1376 = vmatprep.mubr.f32.mxu1 %v960_v29 }
 0x133   :  { %1377 = vmatmul.mubr.f32.vlgmr.msra.gmra.mrb[2].mxu1 %v957_v30 }
 0x134   :  { %1849 = vmatpush3.bf16.msra.mxu0 %v1848_v14  ;;  %1864 = vmatpush3.bf16.msra.mxu1 %v1863_v20 }
 0x135   :  { %1851 = vmatprep.subr.bf16.mxu0 %v1850_v31  ;;  %1865 = vmatprep.subr.bf16.mxu1 %v1965_v52  ;;  %v1858_v52 = vpack.c.bf16 %v1094_v32, %v1093_v39 }
 0x136   :  { %1725 = vmatprep.mubr.msk.f32.mxu1 %vm1966_vm0, %v1967_v53 }
 0x137   :  { %v1930_v61 = vpop.permute.xlu0 %1929 }
 0x138   :  { %1853 = vmatpush3.bf16.msra.mxu0 %v1852_v44  ;;  %v1925_v62 = vpop.permute.xlu1 %1924  ;;  %1867 = vmatpush3.bf16.msra.mxu1 %v1866_v42  ;;  %v1931_v7 = vunpack.i.l.bf16 %v1930_v61  ;;  %v1932_v8 = vunpack.i.h.bf16 %v1930_v61 }
 0x139   :  { %v1927_v57 = vunpack.i.h.bf16 %v1925_v62  ;;  %v1926_v60 = vunpack.i.l.bf16 %v1925_v62  ;;  %1855 = vmatprep.subr.bf16.mxu0 %v1854_v45 }
 0x13b   :  { %v964_v53 = vsel %vm940_vm1, %v840_v0, %v1926_v60  ;;  %1726 = vmatmul.mubr.msk.f32.vlgmr.msra.gmra.mrb[4].mxu1 %vm940_vm1, %v1939_v10  ;;  %v961_v11 = vsel %vm940_vm1, %v836_v6, %v1927_v57 }
 0x13c   :  { %1857 = vmatpush3.bf16.msra.mxu0 %v1856_v56  ;;  %v1935_v9 = vpop.permute.xlu1 %1934  ;;  %v965_v2 = vsel %vm942_vm2, %v964_v53, %v1931_v7  ;;  %v962_v37 = vsel %vm942_vm2, %v961_v11, %v1932_v8 }
 0x13d   :  { %v1937_v15 = vunpack.i.h.bf16 %v1935_v9  ;;  %v1936_v16 = vunpack.i.l.bf16 %v1935_v9  ;;  %1859 = vmatprep.subr.bf16.mxu0 %v1858_v52 }
 0x13f   :  { %v966_v0 = vsel %vm944_vm3, %v965_v2, %v1936_v16  ;;  %v963_v18 = vsel %vm944_vm3, %v962_v37, %v1937_v15 }
 0x140   :  { %1861 = vmatpush3.bf16.msra.mxu0 %v1860_v12  ;;  %1446 = vmatprep.mubr.f32.mxu0 %v966_v0 }
 0x143   :  { %1447 = vmatmul.mubr.f32.vlgmr.msra.gmra.mrb[4].mxu0 %v963_v18 }
 0x1e4   :  { %v1593_v34 = vpop.f32.mrb[0].mxu1 }
 0x1e5   :  { %v1594_v43 = vpop.f32.mrb[1].mxu1 }
 0x1e6   :  { %v1595_v6 = vadd.f32 %v1594_v43, %v1593_v34 }
 0x1e8   :  { %v1239_v19 = vadd.f32 %v1595_v6, %v2638_v21 }
 0x1f6   :  { %v1628_v26 = vpop.f32.mrb[2].mxu0 }
 0x1f7   :  { %v1629_v27 = vpop.f32.mrb[3].mxu0 }
 0x1f8   :  { %v1630_v40 = vadd.f32 %v1629_v27, %v1628_v26 }
 0x1fa   :  { %v1309_v35 = vadd.f32 %v1630_v40, %v1239_v19 }
 0x206   :  { %v1663_v28 = vpop.f32.mrb[2].mxu1 }
 0x207   :  { %v1664_v3 = vpop.f32.mrb[3].mxu1 }
 0x208   :  { %v1665_v4 = vadd.f32 %v1664_v3, %v1663_v28 }
 0x20a   :  { %v1379_v1 = vadd.f32 %v1665_v4, %v1309_v35 }
 0x20e   :  { %v1524_v22 = vpop.f32.mrb[4].mxu1 }
 0x20f   :  { %v1727_v17 = vpop.f32.mrb[5].mxu1 }
 0x216   :  { %v1698_v36 = vpop.f32.mrb[4].mxu0 }
 0x217   :  { %v1699_v24 = vpop.f32.mrb[5].mxu0 }
 0x218   :  { %v1700_v58 = vadd.f32 %v1699_v24, %v1698_v36 }
 0x21a   :  { %v1449_v48 = vadd.f32 %v1700_v58, %v1379_v1 }
 0x21c   :  { %v1528_v21 = vadd.f32 %v1524_v22, %v1449_v48 }
 0x21e   :  { %v1536_v49 = vadd.f32 %v1555_v59, %v1528_v21 }
 0x220   :  { %1538 = vst.msk [vmem:[#allocation2] sm:$0xff] %vm1537_vm4, %v1536_v49 }
 0x221   :  { %1951 = shalt.err (!%p1948_p4)
}
 0x222   :  { %s1952_s21 = scalar_lea.hbm %s2748_s6, 128 }
 0x223   :  { %p1953_p5 = scmp.ne.s32.totalorder %s2748_s6, %s1952_s21  ;;  %p1956_p6 = scmp.lt.u32.totalorder %s1952_s21, %s2748_s6 }
 0x225   :  { %p1958_p7 = pnand %p1956_p6, %p1953_p5 }
 0x227   :  { %1961 = shalt.err (!%p1958_p7)
}
 0x228   :  { %1548 = dma.vmem_to_hbm [thread:$0]  %s1546_s22, 128, %s2748_s6, [#allocation3]  }
 0x229   :  { %1962 = dma.done.wait [#allocation3], 128  }
 0x22a   :  { %1963 = vsyncadd [#allocation3], 4294967168 }
 0x22b   :  { %1552 = vsyncpa [#allocation3], 1 }

</bundles_post_ra>
